<compile_context>
chip_gen: v6e
topology: v6e:2x2x1
jax: 0.10.0
libtpu: 0.0.40
codegen_flags: <defaults>
</compile_context>

<pallas_src>
import functools

import jax
import jax.numpy as jnp
from jax.experimental import pallas as pl
from jax.experimental.pallas import tpu as pltpu


def _round_up(x, m):
    return (x + m - 1) // m * m


def policy_kernel(x_ref, w1_ref, b1_ref, w2_ref, b2_ref, o_ref):
    # x_ref : [Np, B, Din]  bf16      w1_ref: [Din, H_p]   bf16
    # b1_ref: [1, H_p]      f32       w2_ref: [H_p, Dout_p] bf16
    # b2_ref: [1, Dout_p]   f32       o_ref : [Np, B, Dout_p] f32
    n_p, b, d_in = x_ref.shape
    d_out_p = o_ref.shape[-1]

    # Flatten the problem axis into M so both matmuls run with M = Np*B rows.
    x = x_ref[...].reshape(n_p * b, d_in)                              # bf16

    # fc1 on the MXU (bf16 inputs, f32 accumulation); bias + ReLU on the VPU in f32.
    h = jnp.dot(x, w1_ref[...], preferred_element_type=jnp.float32)
    h = jnp.maximum(h + b1_ref[...], 0.0)

    # fc2 on the MXU.
    logits = jnp.dot(h.astype(jnp.bfloat16), w2_ref[...],
                     preferred_element_type=jnp.float32)
    logits = logits + b2_ref[...]

    # Per-problem softmax over the batch axis (== nn.Softmax(dim=0) on each [B, dout]
    # problem).  B is fully resident in this tile, so the reduction is exact.
    logits = logits.reshape(n_p, b, d_out_p)
    m = jnp.max(logits, axis=1, keepdims=True)
    e = jnp.exp(logits - m)
    denom = jnp.sum(e, axis=1, keepdims=True)
    o_ref[...] = (e / denom).astype(o_ref.dtype)                       # exact divide


def _choose_block(n, b, target_rows=256):
    """Problems per grid step: aim for ~256 MXU rows, but keep >=2 grid steps
    when possible so the 'parallel' axis can land on both v7x TensorCores."""
    np_block = max(1, min(target_rows // max(b, 1), n))
    if n > 1:
        np_block = min(np_block, -(-n // 2))
    return int(np_block)


@functools.partial(jax.jit, static_argnames=("np_block", "dim_out"))
def _forward_impl(xs, w1_p, b1_p, w2_p, b2_p, np_block, dim_out):
    n, b, d_in = xs.shape
    h_p = w1_p.shape[1]
    dout_p = w2_p.shape[1]

    n_steps = -(-n // np_block)
    n_pad = n_steps * np_block

    xs_b = xs.astype(jnp.bfloat16)                 # halve activation DMA bytes
    if n_pad != n:
        xs_b = jnp.pad(xs_b, ((0, n_pad - n), (0, 0), (0, 0)))

    cost = pl.CostEstimate(
        flops=2 * n_pad * b * (d_in * h_p + h_p * dout_p),
        transcendentals=n_pad * b * dout_p,
        bytes_accessed=(xs_b.size * 2 + w1_p.size * 2 + w2_p.size * 2
                        + b1_p.size * 4 + b2_p.size * 4
                        + n_pad * b * dout_p * 4),
    )

    out_p = pl.pallas_call(
        policy_kernel,
        out_shape=jax.ShapeDtypeStruct((n_pad, b, dout_p), jnp.float32),
        grid=(n_steps,),
        in_specs=[
            pl.BlockSpec((np_block, b, d_in), lambda g: (g, 0, 0)),  # per-block x
            pl.BlockSpec((d_in, h_p), lambda g: (0, 0)),             # resident weights
            pl.BlockSpec((1, h_p), lambda g: (0, 0)),
            pl.BlockSpec((h_p, dout_p), lambda g: (0, 0)),
            pl.BlockSpec((1, dout_p), lambda g: (0, 0)),
        ],
        out_specs=pl.BlockSpec((np_block, b, dout_p), lambda g: (g, 0, 0)),
        compiler_params=pltpu.CompilerParams(
            dimension_semantics=("parallel",)),
        cost_estimate=cost,
    )(xs_b, w1_p, b1_p, w2_p, b2_p)

    # Drop padded problems and padded (uniform-softmax) output columns.
    return out_p[:n, :, :dim_out]


def pack_params(w1_t, b1, w2_t, b2):
    """Pad/cast parameters ONCE (lane-dense 128 feature dims, bf16 weights)."""
    dim_in, hidden = w1_t.shape
    dim_out = w2_t.shape[1]
    h_p = _round_up(hidden, 128)
    dout_p = _round_up(dim_out, 128)
    w1_p = jnp.zeros((dim_in, h_p), jnp.bfloat16).at[:, :hidden].set(
        w1_t.astype(jnp.bfloat16))
    b1_p = jnp.zeros((1, h_p), jnp.float32).at[:, :hidden].set(b1.reshape(1, -1))
    w2_p = jnp.zeros((h_p, dout_p), jnp.bfloat16).at[:hidden, :dim_out].set(
        w2_t.astype(jnp.bfloat16))
    b2_p = jnp.zeros((1, dout_p), jnp.float32).at[:, :dim_out].set(b2.reshape(1, -1))
    return (w1_p, b1_p, w2_p, b2_p, dim_in, hidden, dim_out)


def policy_approx_forward_batched(xs, params):
    """xs: [N, B, dim_in] f32 (N independent policy evaluations) -> [N, B, dim_out]."""
    w1_p, b1_p, w2_p, b2_p, dim_in, _hidden, dim_out = params
    n, b, d_in = xs.shape
    assert d_in == dim_in
    np_block = _choose_block(n, b)
    return _forward_impl(xs, w1_p, b1_p, w2_p, b2_p, np_block, dim_out)


def policy_approx_forward(x, params):
    """Single-problem forward matching PolicyApprox.forward: [B, dim_in] -> [B, dim_out]."""
    return policy_approx_forward_batched(x[None], params)[0]


def init_params(key, dim_in, hidden, dim_out):
    """PyTorch nn.Linear default init: U(-1/sqrt(fan_in), 1/sqrt(fan_in))."""
    k1, k2, k3, k4 = jax.random.split(key, 4)
    bound1 = 1.0 / jnp.sqrt(dim_in)
    bound2 = 1.0 / jnp.sqrt(hidden)
    # PyTorch Linear weight is [out, in]; we store the transposed [in, out] form.
    w1_t = jax.random.uniform(k1, (dim_in, hidden), jnp.float32, -bound1, bound1)
    b1 = jax.random.uniform(k2, (hidden,), jnp.float32, -bound1, bound1)
    w2_t = jax.random.uniform(k3, (hidden, dim_out), jnp.float32, -bound2, bound2)
    b2 = jax.random.uniform(k4, (dim_out,), jnp.float32, -bound2, bound2)
    return w1_t, b1, w2_t, b2


def reference_forward(x, w1_t, b1, w2_t, b2):
    """Pure-JAX reference with the same bf16-matmul / f32-accumulate numerics."""
    h = jnp.dot(x.astype(jnp.bfloat16), w1_t.astype(jnp.bfloat16),
                preferred_element_type=jnp.float32) + b1
    h = jnp.maximum(h, 0.0)
    logits = jnp.dot(h.astype(jnp.bfloat16), w2_t.astype(jnp.bfloat16),
                     preferred_element_type=jnp.float32) + b2
    return jax.nn.softmax(logits, axis=0)


if __name__ == "__main__":
    B, dim_in, hidden, dim_out = 8, 16, 32, 8
    N = 4  # batch of independent policy evaluations (amortizes kernel launch)

    key = jax.random.PRNGKey(0)
    kx, kp = jax.random.split(key)
    xs = jax.random.normal(kx, (N, B, dim_in), dtype=jnp.float32)
    w1_t, b1, w2_t, b2 = init_params(kp, dim_in, hidden, dim_out)
    params = pack_params(w1_t, b1, w2_t, b2)   # padded/cast ONCE, reused every call

    # Single-problem forward (exact module semantics: softmax over dim 0).
    x = xs[0]
    out = jax.block_until_ready(policy_approx_forward(x, params))
    ref = reference_forward(x, w1_t, b1, w2_t, b2)
    assert out.shape == (B, dim_out)
    assert jnp.allclose(out, ref, atol=2e-3, rtol=2e-3), "single-problem mismatch"
    # Exact divide -> columns of softmax(dim=0) sum to 1 to f32 rounding.
    assert jnp.allclose(jnp.sum(out, axis=0), jnp.ones((dim_out,)), atol=1e-4)

    # Batched forward: one pallas_call, Np problems per grid step, "parallel" axis.
    out_b = jax.block_until_ready(policy_approx_forward_batched(xs, params))
    ref_b = jax.vmap(lambda xi: reference_forward(xi, w1_t, b1, w2_t, b2))(xs)
    assert out_b.shape == (N, B, dim_out)
    assert jnp.allclose(out_b, ref_b, atol=2e-3, rtol=2e-3), "batched mismatch"
    assert jnp.allclose(jnp.sum(out_b, axis=1), jnp.ones((N, dim_out)), atol=1e-4)

    print("KERNEL_OK")
</pallas_src>

<mosaic_0001>
module attributes {stable_mosaic.version = 11 : i64} {
  func.func @policy_kernel(%arg0: i32, %arg1: memref<1x8x16xbf16, #tpu.memory_space<vmem>>, %arg2: memref<16x128xbf16, #tpu.memory_space<vmem>>, %arg3: memref<1x128xf32, #tpu.memory_space<vmem>>, %arg4: memref<128x128xbf16, #tpu.memory_space<vmem>>, %arg5: memref<1x128xf32, #tpu.memory_space<vmem>>, %arg6: memref<1x8x128xf32, #tpu.memory_space<vmem>>) attributes {dimension_semantics = [#tpu.dimension_semantics<parallel>], iteration_bounds = array<i64: 1>, scalar_prefetch = 0 : i64, scratch_operands = 0 : i64, tpu.core_type = #tpu.core_type<tc>, window_params = [{transform_indices = @transform_0, window_bounds = array<i64: 1, 8, 16>}, {pipeline_mode = #tpu.pipeline_mode<synchronous>, transform_indices = @transform_1, window_bounds = array<i64: 16, 128>}, {pipeline_mode = #tpu.pipeline_mode<synchronous>, transform_indices = @transform_2, window_bounds = array<i64: 1, 128>}, {pipeline_mode = #tpu.pipeline_mode<synchronous>, transform_indices = @transform_3, window_bounds = array<i64: 128, 128>}, {pipeline_mode = #tpu.pipeline_mode<synchronous>, transform_indices = @transform_4, window_bounds = array<i64: 1, 128>}, {transform_indices = @transform_5, window_bounds = array<i64: 1, 8, 128>}]} {
    %c0 = arith.constant 0 : index
    %c0_0 = arith.constant 0 : index
    %c0_1 = arith.constant 0 : index
    %0 = vector.load %arg1[%c0, %c0_0, %c0_1] : memref<1x8x16xbf16, #tpu.memory_space<vmem>>, vector<1x8x16xbf16>
    %1 = vector.shape_cast %0 : vector<1x8x16xbf16> to vector<8x16xbf16>
    %c0_2 = arith.constant 0 : index
    %c0_3 = arith.constant 0 : index
    %2 = vector.load %arg2[%c0_2, %c0_3] : memref<16x128xbf16, #tpu.memory_space<vmem>>, vector<16x128xbf16>
    %cst = arith.constant dense<0.000000e+00> : vector<8x128xf32>
    %3 = tpu.matmul %1, %2, %cst {dimension_numbers = #tpu.dot_dimension_numbers<[1], [0], [0], [1], [0, 0, 1, 1], [], []>} : vector<8x16xbf16>, vector<16x128xbf16>, vector<8x128xf32> -> vector<8x128xf32>
    %c0_4 = arith.constant 0 : index
    %c0_5 = arith.constant 0 : index
    %4 = vector.load %arg3[%c0_4, %c0_5] : memref<1x128xf32, #tpu.memory_space<vmem>>, vector<1x128xf32>
    %5 = vector.broadcast %4 : vector<1x128xf32> to vector<8x128xf32>
    %6 = arith.addf %3, %5 : vector<8x128xf32>
    %cst_6 = arith.constant 0.000000e+00 : f32
    %7 = vector.broadcast %cst_6 : f32 to vector<8x128xf32>
    %8 = arith.maximumf %6, %7 : vector<8x128xf32>
    %9 = arith.truncf %8 : vector<8x128xf32> to vector<8x128xbf16>
    %c0_7 = arith.constant 0 : index
    %c0_8 = arith.constant 0 : index
    %10 = vector.load %arg4[%c0_7, %c0_8] : memref<128x128xbf16, #tpu.memory_space<vmem>>, vector<128x128xbf16>
    %cst_9 = arith.constant dense<0.000000e+00> : vector<8x128xf32>
    %11 = tpu.matmul %9, %10, %cst_9 {dimension_numbers = #tpu.dot_dimension_numbers<[1], [0], [0], [1], [0, 0, 1, 1], [], []>} : vector<8x128xbf16>, vector<128x128xbf16>, vector<8x128xf32> -> vector<8x128xf32>
    %c0_10 = arith.constant 0 : index
    %c0_11 = arith.constant 0 : index
    %12 = vector.load %arg5[%c0_10, %c0_11] : memref<1x128xf32, #tpu.memory_space<vmem>>, vector<1x128xf32>
    %13 = vector.broadcast %12 : vector<1x128xf32> to vector<8x128xf32>
    %14 = arith.addf %11, %13 : vector<8x128xf32>
    %15 = vector.shape_cast %14 : vector<8x128xf32> to vector<1x8x128xf32>
    %cst_12 = arith.constant dense<0xFF800000> : vector<1x128xf32>
    %16 = vector.multi_reduction <maximumf>, %15, %cst_12 [1] : vector<1x8x128xf32> to vector<1x128xf32>
    %17 = vector.shape_cast %16 : vector<1x128xf32> to vector<1x1x128xf32>
    %18 = vector.broadcast %17 : vector<1x1x128xf32> to vector<1x8x128xf32>
    %19 = arith.subf %15, %18 : vector<1x8x128xf32>
    %20 = math.exp %19 : vector<1x8x128xf32>
    %cst_13 = arith.constant dense<0.000000e+00> : vector<1x128xf32>
    %21 = vector.multi_reduction <add>, %20, %cst_13 [1] : vector<1x8x128xf32> to vector<1x128xf32>
    %22 = vector.shape_cast %21 : vector<1x128xf32> to vector<1x1x128xf32>
    %23 = vector.broadcast %22 : vector<1x1x128xf32> to vector<1x8x128xf32>
    %24 = arith.divf %20, %23 : vector<1x8x128xf32>
    %c0_14 = arith.constant 0 : index
    %c0_15 = arith.constant 0 : index
    %c0_16 = arith.constant 0 : index
    %25 = vector.load %arg6[%c0_14, %c0_15, %c0_16] : memref<1x8x128xf32, #tpu.memory_space<vmem>>, vector<1x8x128xf32>
    tpu.vector_store %arg6[%c0_14, %c0_15, %c0_16], %24 {strides = array<i32>} : memref<1x8x128xf32, #tpu.memory_space<vmem>>, vector<1x8x128xf32>,
    return
  }
  func.func @transform_0(%arg0: i32) -> (i32, i32, i32) {
    %c0_i32 = arith.constant 0 : i32
    %c0_i32_0 = arith.constant 0 : i32
    %c0_i32_1 = arith.constant 0 : i32
    return %arg0, %c0_i32, %c0_i32_0 : i32, i32, i32
  }
  func.func @transform_1(%arg0: i32) -> (i32, i32) {
    %c0_i32 = arith.constant 0 : i32
    %c0_i32_0 = arith.constant 0 : i32
    %c0_i32_1 = arith.constant 0 : i32
    return %c0_i32, %c0_i32_0 : i32, i32
  }
  func.func @transform_2(%arg0: i32) -> (i32, i32) {
    %c0_i32 = arith.constant 0 : i32
    %c0_i32_0 = arith.constant 0 : i32
    %c0_i32_1 = arith.constant 0 : i32
    return %c0_i32, %c0_i32_0 : i32, i32
  }
  func.func @transform_3(%arg0: i32) -> (i32, i32) {
    %c0_i32 = arith.constant 0 : i32
    %c0_i32_0 = arith.constant 0 : i32
    %c0_i32_1 = arith.constant 0 : i32
    return %c0_i32, %c0_i32_0 : i32, i32
  }
  func.func @transform_4(%arg0: i32) -> (i32, i32) {
    %c0_i32 = arith.constant 0 : i32
    %c0_i32_0 = arith.constant 0 : i32
    %c0_i32_1 = arith.constant 0 : i32
    return %c0_i32, %c0_i32_0 : i32, i32
  }
  func.func @transform_5(%arg0: i32) -> (i32, i32, i32) {
    %c0_i32 = arith.constant 0 : i32
    %c0_i32_0 = arith.constant 0 : i32
    %c0_i32_1 = arith.constant 0 : i32
    return %arg0, %c0_i32, %c0_i32_0 : i32, i32, i32
  }
}

</mosaic_0001>

<bundles_post_ra>
// kernel: _forward_impl.1
= control target key start
LH: loop header
LB: loop body
LE: loop exit
PB: predicated region body
PF: predicated region fallthrough
CT: control target
= control target key end

     0   :  { %10 = vsyncpa [#allocation3], 0  ;;  %s408_s0 = inlined_call_operand.vmem [shape: bf16[1,8,16], index: 0, kind: input, shape index: {}]   ;;  %s409_s1 = inlined_call_operand.vmem [shape: bf16[16,128], index: 1, kind: input, shape index: {}]   ;;  %s410_s2 = inlined_call_operand.vmem [shape: f32[1,128], index: 2, kind: input, shape index: {}]   ;;  %s411_s3 = inlined_call_operand.hbm [shape: bf16[128,128], index: 3, kind: input, shape index: {}]   ;;  %s412_s4 = inlined_call_operand.vmem [shape: f32[1,128], index: 4, kind: input, shape index: {}]   ;;  %s413_s5 = inlined_call_operand.hbm [shape: f32[1,8,128], index: 5, kind: output, shape index: {}]  }
   0x1   :  { %11 = vsyncpa [#allocation4], 0  ;;  %s354_s18 = smov [#allocation2]  }
   0x2   :  { %s23_s19 = sshll.u32 %s354_s18, 4  ;;  %s24_s19 = int_to_ptr.vmem [resolvable:$true] %s23_s19 }
   0x3   :  { %s318_s20 = scalar_lea.vmem %s24_s19, 1024  ;;  %p323_p1 = scmp.lt.s32.totalorder %s24_s19, %s24_s19 }
   0x4   :  { %p319_p0 = scmp.ne.s32.totalorder %s24_s19, %s318_s20  ;;  %p324_p2 = scmp.lt.s32.totalorder %s318_s20, %s318_s20 }
   0x6   :  { %p325_p3 = por %p324_p2, %p323_p1 }
   0x8   :  { %p326_p4 = pnand %p325_p3, %p319_p0 }
   0xa   :  { %329 = shalt.err (!%p326_p4)
}
   0xb   :  { %s355_s21 = smov 64   ;;  %s356_s22 = smov 4  }
   0xc   :  { %29 = dma.hbm_to_vmem [thread:$0]  %s411_s3, 1024, %s24_s19, [#allocation3], %s355_s21, %s355_s21, %s356_s22  }
   0xd   :  { %350 = dma.done.wait [#allocation3], 1024  }
   0xe   :  { %351 = vsyncadd [#allocation3], 4294966272  ;;  %v357_v0 = vmov 0.0   ;;  %vm358_vm0 = vmmov 0   ;;  %v297_v1 = vld [vmem:[%s409_s1] sm:$0xff]   ;;  %vm52_vm1 = vcmask 130048  }
   0xf   :  { %265 = vmatprep.subr.bf16.mxu0 %v357_v0  ;;  %267 = vmatprep.mubr.msk.bf16.mxu0 %vm358_vm0, %v357_v0  ;;  %v36_v2 = vld [vmem:[%s408_s0] sm:$0xf]  ;;  %v298_v3 = vld [vmem:[#allocation2 + $0x38] sm:$0xff]   ;;  %v299_v4 = vld [vmem:[#allocation2 + $0x30] sm:$0xff]  }
  0x10   :  { %271 = vmatprep.subr.bf16.mxu1 %v357_v0  ;;  %287 = vmatprep.mubr.msk.bf16.mxu1 %vm358_vm0, %v357_v0  ;;  %v300_v5 = vld [vmem:[#allocation2 + $0x28] sm:$0xff]   ;;  %v301_v6 = vld [vmem:[#allocation2 + $0x20] sm:$0xff]   ;;  %v302_v7 = vld [vmem:[#allocation2 + $0x18] sm:$0xff]  }
  0x11   :  { %266 = vmatpush3.bf16.msra.mxu0 %v297_v1  ;;  %272 = vmatpush3.bf16.msra.mxu1 %v298_v3  ;;  %v303_v8 = vld [vmem:[#allocation2 + $0x10] sm:$0xff]   ;;  %v304_v9 = vld [vmem:[#allocation2 + $0x8] sm:$0xff]   ;;  %v305_v10 = vld [vmem:[#allocation2] sm:$0xff]  }
  0x12   :  { %273 = vmatprep.subr.bf16.mxu1 %v357_v0  ;;  %v242_v11 = vld [vmem:[%s410_s2] ss:$0 sm:$0xff]  ;;  %s359_s2 = smov [#allocation5]  }
  0x13   :  { %v245_v19 = vld [vmem:[%s412_s4] ss:$0 sm:$0xff]  ;;  %s233_s4 = sshll.u32 %s359_s2, 4  ;;  %s234_s4 = int_to_ptr.vmem [resolvable:$true] %s233_s4 }
  0x14   :  { %268 = vmatmul.mubr.msk.bf16.vlgmr.msra.gmra.mxu0 %vm52_vm1, %v36_v2  ;;  %s330_s30 = scalar_lea.vmem %s234_s4, 128  ;;  %p335_p6 = scmp.lt.s32.totalorder %s234_s4, %s234_s4 }
  0x15   :  { %274 = vmatpush3.bf16.msra.mxu1 %v299_v4  ;;  %p331_p5 = scmp.ne.s32.totalorder %s234_s4, %s330_s30  ;;  %p336_p7 = scmp.lt.s32.totalorder %s330_s30, %s330_s30 }
  0x16   :  { %275 = vmatprep.subr.bf16.mxu1 %v357_v0 }
  0x17   :  { %p337_p8 = por %p336_p7, %p335_p6 }
  0x19   :  { %276 = vmatpush3.bf16.msra.mxu1 %v300_v5  ;;  %p338_p9 = pnand %p337_p8, %p331_p5 }
  0x1a   :  { %277 = vmatprep.subr.bf16.mxu1 %v357_v0 }
  0x1d   :  { %278 = vmatpush3.bf16.msra.mxu1 %v301_v6 }
  0x1e   :  { %279 = vmatprep.subr.bf16.mxu1 %v357_v0 }
  0x21   :  { %280 = vmatpush3.bf16.msra.mxu1 %v302_v7 }
  0x22   :  { %281 = vmatprep.subr.bf16.mxu1 %v357_v0 }
  0x25   :  { %282 = vmatpush3.bf16.msra.mxu1 %v303_v8 }
  0x26   :  { %283 = vmatprep.subr.bf16.mxu1 %v357_v0 }
  0x29   :  { %284 = vmatpush3.bf16.msra.mxu1 %v304_v9 }
  0x2a   :  { %285 = vmatprep.subr.bf16.mxu1 %v357_v0 }
  0x2d   :  { %286 = vmatpush3.bf16.msra.mxu1 %v305_v10 }
  0xd4   :  { %v90_v12 = vpop.f32.mrf.mxu0 }
  0xd5   :  { %v91_v13 = vadd.f32 %v242_v11, %v90_v12 }
  0xd6   :  { %v269_v14 = vpop.f32.mrf.mxu0 }
  0xd7   :  { %v96_v15 = vmax.f32 %v91_v13, 0.0 }
  0xd8   :  { %v93_v16 = vpop.f32.mrf.mxu0 }
  0xd9   :  { %v97_v17 = vpack.c.bf16 %v96_v15, %v96_v15 }
  0xda   :  { %v270_v18 = vpop.f32.mrf.mxu0 }
  0xdb   :  { %288 = vmatmul.mubr.bf16.vlgmr.msra.gmra.mxu1 %v97_v17 }
 0x19b   :  { %v203_v20 = vpop.f32.mrf.mxu1 }
 0x19c   :  { %v204_v21 = vadd.f32 %v245_v19, %v203_v20 }
 0x19d   :  { %v289_v22 = vpop.f32.mrf.mxu1 }
 0x19e   :  { %v209_v23 = vrot.slane %v204_v21, 4 }
 0x19f   :  { %v206_v24 = vpop.f32.mrf.mxu1 }
 0x1a0   :  { %v210_v25 = vmax.f32 %v204_v21, %v209_v23 }
 0x1a1   :  { %v290_v26 = vpop.f32.mrf.mxu1 }
 0x1a2   :  { %v211_v27 = vrot.slane %v210_v25, 2 }
 0x1a4   :  { %v212_v28 = vmax.f32 %v210_v25, %v211_v27 }
 0x1a6   :  { %v213_v29 = vrot.slane %v212_v28, 1 }
 0x1a8   :  { %v214_v30 = vmax.f32 %v212_v28, %v213_v29 }
 0x1aa   :  { %v215_v31 = vsub.f32 %v204_v21, %v214_v30 }
 0x1ac   :  { %v216_v32 = vmul.f32 1.442695, %v215_v31 }
 0x1ae   :  { %306 = vpow2.f32 %v216_v32 }
 0x1bb   :  { %v307_v33 = vpop.eup %306 }
 0x1bc   :  { %v218_v34 = vrot.slane %v307_v33, 4 }
 0x1be   :  { %v219_v35 = vadd.f32 %v307_v33, %v218_v34 }
 0x1c0   :  { %v220_v36 = vrot.slane %v219_v35, 2 }
 0x1c2   :  { %v221_v37 = vadd.f32 %v220_v36, %v219_v35 }
 0x1c4   :  { %v222_v38 = vrot.slane %v221_v37, 1 }
 0x1c6   :  { %v223_v39 = vadd.f32 %v222_v38, %v221_v37 }
 0x1c8   :  { %308 = vrcp.f32 %v223_v39 }
 0x1d5   :  { %v309_v40 = vpop.eup %308 }
 0x1d6   :  { %v225_v41 = vmul.f32 %v309_v40, %v307_v33 }
 0x1d8   :  { %226 = vst [vmem:[#allocation5] sm:$0xff] %v225_v41 }
 0x1d9   :  { %341 = shalt.err (!%p338_p9)
}
 0x1da   :  { %236 = dma.vmem_to_hbm [thread:$0]  %s234_s4, 128, %s413_s5, [#allocation4]  }
 0x1db   :  { %352 = dma.done.wait [#allocation4], 128  }
 0x1dc   :  { %353 = vsyncadd [#allocation4], 4294967168 }
 0x1dd   :  { %240 = vsyncpa [#allocation3], 1 }
 0x1de   :  { %241 = vsyncpa [#allocation4], 1 }

</bundles_post_ra>
